<compile_context>
chip_gen: v6e
topology: v6e:2x2x1
jax: 0.10.0
libtpu: 0.0.40
codegen_flags: <defaults>
</compile_context>

<pallas_src>
import functools
import math
from dataclasses import dataclass

import jax
import jax.numpy as jnp
from jax.experimental import pallas as pl
from jax.experimental.pallas import tpu as pltpu


@dataclass
class HParams:
    d_word_vec: int = 32
    init_range: float = 0.1
    pos_emb_size: int | None = None  # None -> sinusoidal branch
    cuda: bool = False               # unused on TPU


# ----------------------------------------------------------------------------
# Generation-aware VMEM budget (v7x has 64 MiB/TC vs 128 MiB on v5e/v6e).
# ----------------------------------------------------------------------------
def _vmem_budget():
    try:
        cap = pltpu.get_tpu_info().vmem_capacity_bytes
    except Exception:
        cap = 64 << 20  # assume the smallest generation if the query fails
    block_cap = min(8 << 20, cap // 8)          # double-buffered output << budget
    vmem_limit = min(48 << 20, (3 * cap) // 4)  # explicit scoped-VMEM limit
    return block_cap, vmem_limit


# ----------------------------------------------------------------------------
# Flat-table layout planner.
#   View the L*D table as (R, C):
#     * C = lcm(D, 128) when it divides L*D  -> lane-dense, unmasked stores,
#       and col = c % D is row-invariant so per-column constants still work.
#     * otherwise fall back to the natural (L, D) layout (full last dim; legal
#       but masked stores if D % 128 != 0 — only a perf hazard).
#   Row tile TR: divisor of R, multiple of 8 (or == R), block <= block_cap,
#   preferring an even number of >= 2 grid steps (v7x two-TC balance).
# ----------------------------------------------------------------------------
def _plan_table_layout(L, D, itemsize, block_cap):
    N = L * D
    g = (D * 128) // math.gcd(D, 128)  # lcm(D, 128)
    C = g if N % g == 0 else D
    R = N // C
    cands = [
        tr for tr in range(1, R + 1)
        if R % tr == 0
        and (tr % 8 == 0 or tr == R)            # (8,128) tiling rule
        and tr * C * itemsize <= block_cap
    ]
    if not cands:
        cands = [R]  # table with no well-shaped divisor under the cap (rare)

    def score(tr):
        nt = R // tr
        return (nt >= 2 and nt % 2 == 0,  # even step count (v7x)
                nt >= 2,                  # >= 2 parallel steps
                tr)                       # then biggest tile / fewest steps

    TR = max(cands, key=score)
    return R, C, TR


# ----------------------------------------------------------------------------
# Sinusoidal branch.
#   const_ref: (2, C)  row 0 = per-flat-row angle increment  (C//D)*inv_freq(c%D)
#                      row 1 = base angle (c//D)*inv_freq(c%D) + phase(c%D)
#   o_ref:     (TR, C) sublane/lane-dense tile of the flat table.
#   angle(r, c) = r * rowfreq(c) + base(c) == pos * inv_freq(col) + phase(col)
#   value = sin(angle) * emb_scale   (cos realized as sin(.+pi/2) -> 1 EUP op)
# ----------------------------------------------------------------------------
def _sinusoid_kernel(const_ref, o_ref, *, emb_scale, tile_rows):
    t = pl.program_id(0)
    row = jax.lax.broadcasted_iota(jnp.int32, (tile_rows, 1), 0) + t * tile_rows
    angle = row.astype(jnp.float32) * const_ref[0:1, :] + const_ref[1:2, :]
    o_ref[...] = (jnp.sin(angle) * emb_scale).astype(o_ref.dtype)


def sinusoidal_pos_table(max_len, hparams: HParams, dtype=jnp.float32):
    L, D = max_len, hparams.d_word_vec
    emb_scale = float(hparams.init_range * D)
    block_cap, vmem_limit = _vmem_budget()
    R, C, TR = _plan_table_layout(L, D, jnp.dtype(dtype).itemsize, block_cap)
    n_tiles = R // TR

    # Host-precomputed per-column constants for the (R, C) flat view.
    col = jnp.arange(C, dtype=jnp.int32) % D
    inv_freq = (1.0 / (10000.0 ** ((2 * (col // 2)).astype(jnp.float32) / D))
                ).astype(jnp.float32)
    phase = jnp.where(col % 2 == 0, 0.0, jnp.pi / 2).astype(jnp.float32)
    rowfreq = (float(C // D) * inv_freq).astype(jnp.float32)
    base = ((jnp.arange(C, dtype=jnp.int32) // D).astype(jnp.float32) * inv_freq
            + phase).astype(jnp.float32)
    consts = jnp.stack([rowfreq, base], axis=0)  # (2, C)

    kernel = functools.partial(_sinusoid_kernel, emb_scale=emb_scale, tile_rows=TR)
    out = pl.pallas_call(
        kernel,
        out_shape=jax.ShapeDtypeStruct((R, C), dtype),
        grid_spec=pltpu.PrefetchScalarGridSpec(
            num_scalar_prefetch=0,
            grid=(n_tiles,),
            in_specs=[pl.BlockSpec((2, C), lambda t: (0, 0))],   # resident constants
            out_specs=pl.BlockSpec((TR, C), lambda t: (t, 0)),
        ),
        compiler_params=pltpu.CompilerParams(
            dimension_semantics=("parallel",),
            vmem_limit_bytes=vmem_limit),
    )(consts)
    return out.reshape(L, D)


# ----------------------------------------------------------------------------
# Learned-embedding branch: positions are arange(L) + 1 (data-independent), so
# the embedding lookup is the contiguous row slice table[1 : 1+L], done inside
# the kernel.  Only the [L, D] table is written; the wrapper broadcasts to B.
# ----------------------------------------------------------------------------
def _embed_lookup_kernel(tab_ref, o_ref, *, max_len):
    o_ref[...] = tab_ref[pl.ds(1, max_len), :]


def learned_pos_table(max_len, table):
    P, D = table.shape
    L = max_len
    # VMEM reads have no runtime bounds check -> guard the slice explicitly.
    assert P >= L + 1, (
        f"pos_emb_size ({P}) must be >= max_len + 1 ({L + 1}) for the lookup")
    _, vmem_limit = _vmem_budget()
    # TODO(synk): tile the lookup over L for tables too large to sit in VMEM.
    return pl.pallas_call(
        functools.partial(_embed_lookup_kernel, max_len=L),
        out_shape=jax.ShapeDtypeStruct((L, D), table.dtype),
        grid_spec=pltpu.PrefetchScalarGridSpec(
            num_scalar_prefetch=0,
            grid=(1,),
            in_specs=[pl.BlockSpec((P, D), lambda i: (0, 0))],
            out_specs=pl.BlockSpec((L, D), lambda i: (0, 0)),
        ),
        compiler_params=pltpu.CompilerParams(
            dimension_semantics=("arbitrary",),
            vmem_limit_bytes=vmem_limit),
    )(table)


# ----------------------------------------------------------------------------
# Module-like wrapper
# ----------------------------------------------------------------------------
class PositionalEmbeddingPallas:
    def __init__(self, hparams: HParams, key=None):
        self.hparams = hparams
        if hparams.pos_emb_size is not None:
            assert key is not None
            # deterministic init of nn.Embedding weight; padding_idx=0 -> row 0 zero
            w = jax.random.normal(
                key, (hparams.pos_emb_size, hparams.d_word_vec), jnp.float32)
            self.table = w.at[0].set(0.0)
        else:
            self.table = None

    def __call__(self, x):
        B, L = x.shape
        if self.hparams.pos_emb_size is not None:
            tab = learned_pos_table(L, self.table)
        else:
            tab = sinusoidal_pos_table(L, self.hparams)
        # Batch-invariant result: broadcast in the wrapper (no B x HBM writes).
        return jnp.broadcast_to(tab[None], (B,) + tab.shape)


# ----------------------------------------------------------------------------
# Pure-JAX reference (mirrors PyTorch forward semantics)
# ----------------------------------------------------------------------------
def reference(x, hparams: HParams, table=None):
    B, L = x.shape
    D = hparams.d_word_vec
    pos = jnp.arange(L, dtype=jnp.float32)
    if hparams.pos_emb_size is not None:
        idx = (pos + 1).astype(jnp.int32)
        emb = table[idx]                                   # (L, D)
        return jnp.broadcast_to(emb[None], (B, L, D))
    freq = 1.0 / (10000.0 ** (jnp.arange(0, D, 2, dtype=jnp.float32) / D))
    emb_scale = hparams.init_range * D
    ang = pos[:, None] * freq[None, :]                     # (L, D/2)
    sin = (jnp.sin(ang) * emb_scale)[..., None]
    cos = (jnp.cos(ang) * emb_scale)[..., None]
    emb = jnp.concatenate([sin, cos], axis=-1).reshape(L, D)
    return jnp.broadcast_to(emb[None], (B, L, D))


if __name__ == "__main__":
    key = jax.random.PRNGKey(0)
    k_x, k_emb = jax.random.split(key)

    B, L, D = 2, 8, 32
    x = jax.random.randint(k_x, (B, L), 0, 10, dtype=jnp.int32)

    # --- sinusoidal branch (pos_emb_size=None) ---
    hp_sin = HParams(d_word_vec=D, init_range=0.1, pos_emb_size=None)
    mod_sin = PositionalEmbeddingPallas(hp_sin)
    out_sin = jax.block_until_ready(mod_sin(x))
    ref_sin = reference(x, hp_sin)
    assert out_sin.shape == (B, L, D)
    assert jnp.allclose(out_sin, ref_sin, atol=1e-5, rtol=1e-5)

    # --- learned-embedding branch (pos_emb_size=16) ---
    hp_emb = HParams(d_word_vec=D, init_range=0.1, pos_emb_size=16)
    mod_emb = PositionalEmbeddingPallas(hp_emb, key=k_emb)
    out_emb = jax.block_until_ready(mod_emb(x))
    ref_emb = reference(x, hp_emb, table=mod_emb.table)
    assert out_emb.shape == (B, L, D)
    assert jnp.allclose(out_emb, ref_emb, atol=1e-6, rtol=1e-6)

    print("KERNEL_OK")
</pallas_src>

<mosaic_0001>
module attributes {stable_mosaic.version = 11 : i64} {
  func.func @_sinusoid_kernel(%arg0: i32, %arg1: memref<2x128xf32, #tpu.memory_space<vmem>>, %arg2: memref<2x128xf32, #tpu.memory_space<vmem>>) attributes {dimension_semantics = [#tpu.dimension_semantics<parallel>], iteration_bounds = array<i64: 1>, scalar_prefetch = 0 : i64, scratch_operands = 0 : i64, tpu.core_type = #tpu.core_type<tc>, window_params = [{pipeline_mode = #tpu.pipeline_mode<synchronous>, transform_indices = @transform_0, window_bounds = array<i64: 2, 128>}, {transform_indices = @transform_1, window_bounds = array<i64: 2, 128>}]} {
    %0 = tpu.iota {dimensions = array<i32: 0>} : vector<2x1xi32>
    %c2_i32 = arith.constant 2 : i32
    %1 = arith.muli %arg0, %c2_i32 : i32
    %2 = vector.broadcast %1 : i32 to vector<2x1xi32>
    %3 = arith.addi %0, %2 : vector<2x1xi32>
    %4 = arith.sitofp %3 : vector<2x1xi32> to vector<2x1xf32>
    %c0 = arith.constant 0 : index
    %c0_0 = arith.constant 0 : index
    %5 = vector.load %arg1[%c0, %c0_0] : memref<2x128xf32, #tpu.memory_space<vmem>>, vector<1x128xf32>
    %6 = vector.broadcast %4 : vector<2x1xf32> to vector<2x128xf32>
    %7 = vector.broadcast %5 : vector<1x128xf32> to vector<2x128xf32>
    %8 = arith.mulf %6, %7 : vector<2x128xf32>
    %c1 = arith.constant 1 : index
    %c0_1 = arith.constant 0 : index
    %9 = vector.load %arg1[%c1, %c0_1] : memref<2x128xf32, #tpu.memory_space<vmem>>, vector<1x128xf32>
    %10 = vector.broadcast %9 : vector<1x128xf32> to vector<2x128xf32>
    %11 = arith.addf %8, %10 : vector<2x128xf32>
    %12 = math.sin %11 : vector<2x128xf32>
    %cst = arith.constant 3.200000e+00 : f32
    %13 = vector.broadcast %cst : f32 to vector<2x128xf32>
    %14 = arith.mulf %12, %13 : vector<2x128xf32>
    %c0_2 = arith.constant 0 : index
    %c0_3 = arith.constant 0 : index
    %15 = vector.load %arg2[%c0_2, %c0_3] : memref<2x128xf32, #tpu.memory_space<vmem>>, vector<2x128xf32>
    tpu.vector_store %arg2[%c0_2, %c0_3], %14 {strides = array<i32>} : memref<2x128xf32, #tpu.memory_space<vmem>>, vector<2x128xf32>,
    return
  }
  func.func @transform_0(%arg0: i32) -> (i32, i32) {
    %c0_i32 = arith.constant 0 : i32
    %c0_i32_0 = arith.constant 0 : i32
    %c0_i32_1 = arith.constant 0 : i32
    return %c0_i32, %c0_i32_0 : i32, i32
  }
  func.func @transform_1(%arg0: i32) -> (i32, i32) {
    %c0_i32 = arith.constant 0 : i32
    %c0_i32_0 = arith.constant 0 : i32
    return %arg0, %c0_i32 : i32, i32
  }
}

</mosaic_0001>

<bundles_post_ra>
// kernel: tpu_custom_call.1
= control target key start
LH: loop header
LB: loop body
LE: loop exit
PB: predicated region body
PF: predicated region fallthrough
CT: control target
= control target key end

     0   :  { %6 = vsyncpa [#allocation3], 0  ;;  %s271_s0 = inlined_call_operand.hbm [shape: f32[2,128], index: 0, kind: input, shape index: {}]   ;;  %s272_s1 = inlined_call_operand.hbm [shape: f32[2,128], index: 1, kind: output, shape index: {}]  }
   0x1   :  { %7 = vsyncpa [#allocation4], 0  ;;  %s226_s6 = smov [#allocation2]  }
   0x2   :  { %s14_s7 = sshll.u32 %s226_s6, 4  ;;  %s15_s7 = int_to_ptr.vmem [resolvable:$true] %s14_s7 }
   0x3   :  { %s190_s8 = scalar_lea.vmem %s15_s7, 32  ;;  %p195_p1 = scmp.lt.s32.totalorder %s15_s7, %s15_s7 }
   0x4   :  { %p191_p0 = scmp.ne.s32.totalorder %s15_s7, %s190_s8  ;;  %p196_p2 = scmp.lt.s32.totalorder %s190_s8, %s190_s8 }
   0x6   :  { %p197_p3 = por %p196_p2, %p195_p1 }
   0x8   :  { %p198_p4 = pnand %p197_p3, %p191_p0 }
   0xa   :  { %201 = shalt.err (!%p198_p4)
}
   0xb   :  { %17 = dma.hbm_to_vmem [thread:$0]  %s271_s0, 32, %s15_s7, [#allocation3]  }
   0xc   :  { %222 = dma.done.wait [#allocation3], 32  }
   0xd   :  { %223 = vsyncadd [#allocation3], 4294967264  ;;  %v21_v0 = vlaneseq  ;;  %v160_v3 = vld [vmem:[#allocation2] ss:$0 sm:$0xff]  ;;  %v161_v4 = vld [vmem:[#allocation2 + $0x1] ss:$0 sm:$0xff] }
   0xe   :  { %v227_v18 = vmov 683565275   ;;  %v228_v20 = vmov 2475754826   ;;  %v229_v22 = vmov 2131351028  }
   0xf   :  { %v22_v1 = vshrl.u32 %v21_v0, 7  ;;  %v230_v24 = vmov 2102212464   ;;  %v231_v26 = vmov 920167782   ;;  %s233_s0 = smov [#allocation5]  }
  0x10   :  { %v232_v33 = vmov 1326507024   ;;  %s151_s11 = sshll.u32 %s233_s0, 4  ;;  %s152_s11 = int_to_ptr.vmem [resolvable:$true] %s151_s11 }
  0x11   :  { %v26_v2 = vcvt.s32.f32 %v22_v1  ;;  %s202_s12 = scalar_lea.vmem %s152_s11, 32  ;;  %p207_p6 = scmp.lt.s32.totalorder %s152_s11, %s152_s11 }
  0x12   :  { %p203_p5 = scmp.ne.s32.totalorder %s152_s11, %s202_s12  ;;  %p208_p7 = scmp.lt.s32.totalorder %s202_s12, %s202_s12 }
  0x13   :  { %v32_v5 = vmul.f32 %v160_v3, %v26_v2 }
  0x14   :  { %p209_p8 = por %p208_p7, %p207_p6 }
  0x15   :  { %v247_v6 = vadd.f32 %v161_v4, %v32_v5 }
  0x16   :  { %p210_p9 = pnand %p209_p8, %p203_p5 }
  0x17   :  { %v42_v7 = vand.u32 2139095040, %v247_v6  ;;  %v39_v9 = vand.u32 2147483647, %v247_v6  ;;  %vm41_vm7 = vcmp.lt.s32.totalorder %v247_v6, 0  ;;  %vm131_vm12 = vweird.f32 %v247_v6 }
  0x19   :  { %v43_v8 = vshrl.u32 %v42_v7, 23  ;;  %v46_v12 = vand.u32 8388607, %v39_v9  ;;  %vm40_vm8 = vcmp.le.f32.partialorder %v39_v9, 0.7853982 }
  0x1b   :  { %v162_v10 = vadd.s32 4294967169, %v43_v8  ;;  %v47_v15 = vor.u32 8388608, %v46_v12 }
  0x1d   :  { %v49_v11 = vadd.s32 1, %v162_v10  ;;  %v87_v35 = vshll.u32 %v47_v15, 8 }
  0x1f   :  { %vm50_vm0 = vcmp.gt.s32.totalorder %v49_v11, 0 }
  0x20   :  { %v51_v13 = vsel %vm50_vm0, %v49_v11, 0 }
  0x21   :  { %v53_v14 = vand.u32 31, %v51_v13  ;;  %v52_v16 = vshrl.u32 %v51_v13, 5 }
  0x23   :  { %v54_v17 = vsub.s32 32, %v53_v14  ;;  %v56_v19 = vshll.u32 %v227_v18, %v53_v14  ;;  %v59_v21 = vshll.u32 %v228_v20, %v53_v14  ;;  %v62_v23 = vshll.u32 %v229_v22, %v53_v14 }
  0x24   :  { %v65_v25 = vshll.u32 %v230_v24, %v53_v14  ;;  %v68_v27 = vshll.u32 %v231_v26, %v53_v14  ;;  %vm71_vm1 = vcmp.lt.s32.totalorder %v52_v16, 1  ;;  %vm74_vm2 = vcmp.lt.s32.totalorder %v52_v16, 4 }
  0x25   :  { %v55_v28 = vshrl.u32 %v227_v18, %v54_v17  ;;  %v57_v29 = vshrl.u32 %v228_v20, %v54_v17  ;;  %v60_v30 = vshrl.u32 %v229_v22, %v54_v17  ;;  %v63_v31 = vshrl.u32 %v230_v24, %v54_v17 }
  0x26   :  { %v66_v32 = vshrl.u32 %v231_v26, %v54_v17  ;;  %v69_v34 = vshrl.u32 %v232_v33, %v54_v17  ;;  %vm72_vm3 = vcmp.lt.s32.totalorder %v52_v16, 2  ;;  %vm73_vm4 = vcmp.lt.s32.totalorder %v52_v16, 3 }
  0x27   :  { %v58_v36 = vor.u32 %v57_v29, %v56_v19  ;;  %v61_v37 = vor.u32 %v60_v30, %v59_v21  ;;  %v64_v38 = vor.u32 %v63_v31, %v62_v23 }
  0x28   :  { %v67_v39 = vor.u32 %v66_v32, %v65_v25  ;;  %v70_v40 = vor.u32 %v69_v34, %v68_v27 }
  0x29   :  { %v75_v41 = vsel %vm71_vm1, %v55_v28, %v58_v36  ;;  %v76_v42 = vsel %vm74_vm2, %v64_v38, 2102212464  ;;  %v79_v43 = vsel %vm71_vm1, %v58_v36, %v61_v37  ;;  %v83_v44 = vsel %vm71_vm1, %v61_v37, %v64_v38 }
  0x2a   :  { %v77_v45 = vsel %vm73_vm4, %v61_v37, %v76_v42  ;;  %v80_v46 = vsel %vm74_vm2, %v67_v39, 920167782  ;;  %v84_v47 = vsel %vm74_vm2, %v70_v40, 1326507024 }
  0x2b   :  { %v81_v48 = vsel %vm73_vm4, %v64_v38, %v80_v46  ;;  %v85_v49 = vsel %vm73_vm4, %v67_v39, %v84_v47  ;;  %v78_v50 = vsel %vm72_vm3, %v75_v41, %v77_v45 }
  0x2c   :  { %v82_v51 = vsel %vm72_vm3, %v79_v43, %v81_v48  ;;  %v86_v52 = vsel %vm72_vm3, %v83_v44, %v85_v49  ;;  %v94_v57 = vmul.u32 %v87_v35, %v78_v50 }
  0x2d   :  { %v253_v53 = vmul.u32.u64.low %v87_v35, %v86_v52  ;;  %v254_v54 = vmul.u32.u64.high %v87_v35, %v86_v52, %v253_v53  ;;  %v256_v55 = vmul.u32.u64.low %v87_v35, %v82_v51  ;;  %v257_v56 = vmul.u32.u64.high %v87_v35, %v82_v51, %v256_v55 }
  0x2f   :  { %vm96_vm5 = vc.u32 %v254_v54, %v256_v55  ;;  %v97_v58 = vadd.s32 1, %v257_v56  ;;  %v95_v5 = vadd.s32 %v256_v55, %v254_v54 }
  0x31   :  { %v98_v59 = vsel %vm96_vm5, %v97_v58, %v257_v56 }
  0x32   :  { %v99_v60 = vadd.s32 %v98_v59, %v94_v57 }
  0x34   :  { %v100_v61 = vadd.s32 536870912, %v99_v60 }
  0x36   :  { %v101_v62 = vshrl.u32 %v100_v61, 30 }
  0x38   :  { %v102_v63 = vshll.u32 %v101_v62, 30  ;;  %v125_v20 = vsub.s32 4, %v101_v62 }
  0x3a   :  { %v103_v0 = vsub.s32 %v99_v60, %v102_v63  ;;  %v126_v23 = vsel %vm41_vm7, %v125_v20, %v101_v62 }
  0x3b   :  { %v128_v25 = vsel %vm40_vm8, 0, %v126_v23 }
  0x3c   :  { %v105_v1 = vsub.s32 0, %v103_v0  ;;  %v132_v26 = vadd.s32 3, %v128_v25 }
  0x3e   :  { %v163_v2 = vmin.u32 %v105_v1, %v103_v0  ;;  %v133_v27 = vand.u32 3, %v132_v26 }
  0x40   :  { %v107_v3 = vclz %v163_v2  ;;  %vm138_vm9 = vcmp.eq.s32.totalorder %v133_v27, 2  ;;  %vm135_vm10 = vcmp.eq.s32.totalorder %v133_v27, 0  ;;  %vm134_vm11 = vcmp.lt.s32.totalorder %v133_v27, 2 }
  0x42   :  { %v164_v4 = vadd.s32 4294967294, %v107_v3 }
  0x44   :  { %vm165_vm6 = vcmp.lt.s32.totalorder %v164_v4, 0 }
  0x45   :  { %v110_v7 = vsel %vm165_vm6, 0, %v164_v4 }
  0x46   :  { %v111_v8 = vsub.s32 32, %v110_v7  ;;  %v112_v10 = vshll.u32 %v103_v0, %v110_v7  ;;  %v115_v11 = vsub.s32 4294967266, %v110_v7 }
  0x48   :  { %v113_v12 = vshrl.u32 %v95_v5, %v111_v8  ;;  %v116_v13 = vadd.s32 127, %v115_v11 }
  0x4a   :  { %v114_v14 = vor.u32 %v113_v12, %v112_v10  ;;  %v117_v15 = vshll.u32 %v116_v13, 23 }
  0x4c   :  { %v118_v16 = vor.u32 4788187, %v117_v15  ;;  %v121_v17 = vcvt.s32.f32 %v114_v14 }
  0x4e   :  { %v119_v18 = vand.u32 2147483647, %v118_v16 }
  0x50   :  { %v122_v19 = vmul.f32 %v121_v17, %v119_v18 }
  0x52   :  { %v123_v21 = vxor.u32 2147483648, %v122_v19 }
  0x54   :  { %v124_v22 = vsel %vm41_vm7, %v123_v21, %v122_v19 }
  0x55   :  { %v127_v24 = vsel %vm40_vm8, %v247_v6, %v124_v22 }
  0x56   :  { %178 = vcosq.f32 %v127_v24 }
  0x57   :  { %180 = vsinq.f32 %v127_v24 }
  0x63   :  { %v179_v28 = vpop.eup %178 }
  0x64   :  { %v181_v29 = vpop.eup %180  ;;  %v139_v30 = vxor.u32 2147483648, %v179_v28 }
  0x65   :  { %v136_v31 = vxor.u32 2147483648, %v181_v29 }
  0x66   :  { %v140_v9 = vsel %vm138_vm9, %v139_v30, %v181_v29 }
  0x67   :  { %v137_v32 = vsel %vm135_vm10, %v179_v28, %v136_v31 }
  0x68   :  { %v141_v33 = vsel %vm134_vm11, %v137_v32, %v140_v9 }
  0x69   :  { %v142_v34 = vsel %vm131_vm12, nan, %v141_v33 }
  0x6a   :  { %v143_v35 = vmul.f32 3.2, %v142_v34 }
  0x6c   :  { %144 = vst [vmem:[#allocation5] sm:$0x3] %v143_v35 }
  0x6d   :  { %213 = shalt.err (!%p210_p9)
}
  0x6e   :  { %154 = dma.vmem_to_hbm [thread:$0]  %s152_s11, 32, %s272_s1, [#allocation4]  }
  0x6f   :  { %224 = dma.done.wait [#allocation4], 32  }
  0x70   :  { %225 = vsyncadd [#allocation4], 4294967264 }
  0x71   :  { %158 = vsyncpa [#allocation3], 1 }
  0x72   :  { %159 = vsyncpa [#allocation4], 1 }

</bundles_post_ra>
